<compile_context>
chip_gen: v7x
topology: tpu7x:2x2x1
jax: 0.10.0
libtpu: 0.0.40
codegen_flags: <defaults>
</compile_context>

<pallas_src>
import jax
import jax.numpy as jnp
from jax.experimental import pallas as pl
from jax.experimental.pallas import tpu as pltpu


def _round_up(a, b):
    return (a + b - 1) // b * b


# ----------------------------------------------------------------------------
# Kernels
# ----------------------------------------------------------------------------
def _resblock_kernel_resident(x_ref, w1_ref, w2_ref, o_ref):
    # x_ref: (tm, C)    w1_ref / w2_ref: (C, C) pre-transposed, bf16
    h = jnp.dot(x_ref[...].astype(w1_ref.dtype), w1_ref[...],
                preferred_element_type=jnp.float32)
    h = jnp.maximum(h, 0.0)                                    # ReLU 1 (f32)
    t = jnp.dot(h.astype(w2_ref.dtype), w2_ref[...],
                preferred_element_type=jnp.float32)
    t = jnp.maximum(t, 0.0)                                    # ReLU 2 (f32)
    # Re-read x for the residual so no f32 x temp stays live across matmuls.
    o_ref[...] = (x_ref[...].astype(jnp.float32) + t).astype(o_ref.dtype)


def _resblock_kernel_ktiled(x_ref, w1_ref, w2_ref, o_ref, acc_ref):
    # grid = (batch tiles, hidden chunks); reduction axis last.
    # x_ref: (tm, C)   w1_ref: (C, tk)   w2_ref: (tk, C)   acc_ref: (tm, C) f32
    k = pl.program_id(1)

    @pl.when(k == 0)
    def _():
        acc_ref[...] = jnp.zeros_like(acc_ref)

    h = jnp.dot(x_ref[...].astype(w1_ref.dtype), w1_ref[...],
                preferred_element_type=jnp.float32)
    h = jnp.maximum(h, 0.0)                                    # ReLU 1 per chunk (exact)
    acc_ref[...] += jnp.dot(h.astype(w2_ref.dtype), w2_ref[...],
                            preferred_element_type=jnp.float32)

    @pl.when(k == pl.num_programs(1) - 1)
    def _():
        t = jnp.maximum(acc_ref[...], 0.0)                     # ReLU 2
        o_ref[...] = (x_ref[...].astype(jnp.float32) + t).astype(o_ref.dtype)


# ----------------------------------------------------------------------------
# Host-side helpers
# ----------------------------------------------------------------------------
def prepare_weights(w1, w2, dtype=jnp.bfloat16):
    """One-time weight prep: PyTorch (out,in) -> (in,out), cast for the MXU."""
    return jnp.asarray(w1).T.astype(dtype), jnp.asarray(w2).T.astype(dtype)


def _vmem_capacity_bytes():
    try:
        return int(pltpu.get_tpu_info().vmem_capacity_bytes)
    except Exception:
        return 64 << 20   # conservative (v7x per-TC)


def _resident_vmem_bytes(tm, c, x_item, w_item):
    weights = 2 * 2 * c * c * w_item           # W1 + W2, double buffered
    pipe = 2 * tm * c * (x_item + x_item)      # x / out double buffers
    inter = tm * c * (4 + 4 + 2 * w_item)      # h, t (f32) + bf16 casts of x, h
    return weights + pipe + inter


def _ktiled_vmem_bytes(tm, tk, c, x_item, w_item):
    weights = 2 * 2 * c * tk * w_item          # (C,tk) + (tk,C) blocks, double buffered
    pipe = 2 * tm * c * (x_item + x_item)      # x / out double buffers
    acc = tm * c * 4                           # accumulator scratch
    inter = tm * tk * (4 + w_item) + tm * c * (4 + w_item)
    return weights + pipe + acc + inter


def _build_resident_call(n, c, tm, x_dtype, w_dtype, vmem_limit):
    x_item = jnp.dtype(x_dtype).itemsize
    w_item = jnp.dtype(w_dtype).itemsize
    cost = pl.CostEstimate(
        flops=4 * n * c * c,
        transcendentals=0,
        bytes_accessed=2 * n * c * x_item + 2 * c * c * w_item,
    )
    return pl.pallas_call(
        _resblock_kernel_resident,
        out_shape=jax.ShapeDtypeStruct((n, c), x_dtype),
        grid_spec=pltpu.PrefetchScalarGridSpec(
            num_scalar_prefetch=0,
            grid=(pl.cdiv(n, tm),),
            in_specs=[
                pl.BlockSpec((tm, c), lambda i: (i, 0)),        # x tile
                pl.BlockSpec((c, c), lambda i: (0, 0)),         # W1^T resident
                pl.BlockSpec((c, c), lambda i: (0, 0)),         # W2^T resident
            ],
            out_specs=pl.BlockSpec((tm, c), lambda i: (i, 0)),
        ),
        compiler_params=pltpu.CompilerParams(
            dimension_semantics=("parallel",),
            vmem_limit_bytes=vmem_limit,
        ),
        cost_estimate=cost,
    )


def _build_ktiled_call(n, c, tm, tk, x_dtype, w_dtype, vmem_limit):
    x_item = jnp.dtype(x_dtype).itemsize
    w_item = jnp.dtype(w_dtype).itemsize
    nm = pl.cdiv(n, tm)
    cost = pl.CostEstimate(
        flops=4 * n * c * c,
        transcendentals=0,
        bytes_accessed=2 * n * c * x_item + nm * 2 * c * c * w_item,
    )
    return pl.pallas_call(
        _resblock_kernel_ktiled,
        out_shape=jax.ShapeDtypeStruct((n, c), x_dtype),
        grid_spec=pltpu.PrefetchScalarGridSpec(
            num_scalar_prefetch=0,
            grid=(nm, c // tk),
            in_specs=[
                pl.BlockSpec((tm, c), lambda i, k: (i, 0)),     # x tile (not re-fetched per k)
                pl.BlockSpec((c, tk), lambda i, k: (0, k)),     # W1^T hidden-column chunk
                pl.BlockSpec((tk, c), lambda i, k: (k, 0)),     # W2^T hidden-row chunk
            ],
            out_specs=pl.BlockSpec((tm, c), lambda i, k: (i, 0)),
            scratch_shapes=[pltpu.VMEM((tm, c), jnp.float32)],
        ),
        compiler_params=pltpu.CompilerParams(
            dimension_semantics=("parallel", "arbitrary"),
            vmem_limit_bytes=vmem_limit,
        ),
        cost_estimate=cost,
    )


def residual_block_pallas(x, w1t, w2t, *, tm=1024, tk=512, force_k_tiling=False):
    """x: (N, C); w1t, w2t: (C, C) pre-transposed (see `prepare_weights`).

    x may be f32 or bf16; the output keeps x's dtype (bf16 I/O halves HBM
    traffic on v6e/v7x where this kernel is bandwidth-bound at C~512).
    """
    N, C = x.shape
    assert w1t.shape == (C, C) and w2t.shape == (C, C)

    x_item = jnp.dtype(x.dtype).itemsize
    w_item = jnp.dtype(w1t.dtype).itemsize
    gran = 16 if x_item < 4 else 8            # sublane tile: bf16 packs 2 rows

    cap = _vmem_capacity_bytes()
    budget = cap - (4 << 20)                  # leave headroom for the compiler

    # --- resident vs K-tiled weights --------------------------------------
    resident_w_bytes = 2 * 2 * C * C * w_item
    use_ktile = force_k_tiling or resident_w_bytes > budget // 2
    if use_ktile:
        tk = min(int(tk), C)
        while tk > 0 and (C % tk != 0 or tk % 128 != 0):
            tk -= 128
        if tk <= 0:                           # no valid divisor chunk -> resident
            use_ktile = False

    # --- batch tile selection ----------------------------------------------
    tm = max(gran, min(int(tm), _round_up(N, gran)))
    tm = _round_up(tm, gran)

    def _needed(tm_):
        if use_ktile:
            return _ktiled_vmem_bytes(tm_, tk, C, x_item, w_item)
        return _resident_vmem_bytes(tm_, C, x_item, w_item)

    while tm > gran and _needed(tm) > budget:
        tm = max(gran, _round_up(tm // 2, gran))

    vmem_needed = _needed(tm)
    vmem_limit = min(cap, max(32 << 20, int(1.25 * vmem_needed) + (2 << 20)))

    if use_ktile:
        call = _build_ktiled_call(N, C, tm, tk, x.dtype, w1t.dtype, vmem_limit)
    else:
        call = _build_resident_call(N, C, tm, x.dtype, w1t.dtype, vmem_limit)
    return call(x, w1t, w2t)


def _reference_matched(x, w1t, w2t):
    """Mirrors the kernel numerics: bf16 MXU operands, f32 accumulation."""
    h = jnp.maximum(jnp.dot(x.astype(w1t.dtype), w1t,
                            preferred_element_type=jnp.float32), 0.0)
    t = jnp.maximum(jnp.dot(h.astype(w2t.dtype), w2t,
                            preferred_element_type=jnp.float32), 0.0)
    return (x.astype(jnp.float32) + t).astype(x.dtype)


if __name__ == "__main__":
    # Module default is nChn=512; keep the batch small for the smoke test.
    N, C = 16, 512

    key = jax.random.PRNGKey(0)
    kx, k1, k2 = jax.random.split(key, 3)
    x = jax.random.normal(kx, (N, C), dtype=jnp.float32)
    # Bias-free Linear weights in PyTorch (out, in) layout, Kaiming-ish scale.
    w1 = jax.random.normal(k1, (C, C), dtype=jnp.float32) * (1.0 / jnp.sqrt(C))
    w2 = jax.random.normal(k2, (C, C), dtype=jnp.float32) * (1.0 / jnp.sqrt(C))

    # One-time weight prep (transpose + bf16 cast) — not paid per call.
    w1t, w2t = prepare_weights(w1, w2)

    ref = _reference_matched(x, w1t, w2t)

    # Resident-weights path (default for C=512).
    out = jax.block_until_ready(residual_block_pallas(x, w1t, w2t))
    assert out.shape == (N, C) and out.dtype == x.dtype
    assert jnp.allclose(out, ref, atol=2e-2, rtol=2e-2), "resident path mismatch"

    # Hidden-dim K-tiled path (used for wide layers / v7x VMEM limits).
    out_kt = jax.block_until_ready(
        residual_block_pallas(x, w1t, w2t, force_k_tiling=True, tk=256))
    assert jnp.allclose(out_kt, ref, atol=2e-2, rtol=2e-2), "k-tiled path mismatch"

    # Loose sanity check against the pure-f32 PyTorch-semantics forward.
    ref32 = x + jnp.maximum(jnp.maximum(x @ w1.T, 0.0) @ w2.T, 0.0)
    assert float(jnp.max(jnp.abs(out - ref32))) < 0.5, "diverges from f32 reference"

    print("KERNEL_OK")
</pallas_src>

<mosaic_0001>
module attributes {stable_mosaic.version = 11 : i64} {
  func.func @_resblock_kernel_resident(%arg0: i32, %arg1: memref<16x512xf32, #tpu.memory_space<vmem>>, %arg2: memref<512x512xbf16, #tpu.memory_space<vmem>>, %arg3: memref<512x512xbf16, #tpu.memory_space<vmem>>, %arg4: memref<16x512xf32, #tpu.memory_space<vmem>>) attributes {dimension_semantics = [#tpu.dimension_semantics<parallel>], iteration_bounds = array<i64: 1>, scalar_prefetch = 0 : i64, scratch_operands = 0 : i64, tpu.core_type = #tpu.core_type<tc>, window_params = [{transform_indices = @transform_0, window_bounds = array<i64: 16, 512>}, {pipeline_mode = #tpu.pipeline_mode<synchronous>, transform_indices = @transform_1, window_bounds = array<i64: 512, 512>}, {pipeline_mode = #tpu.pipeline_mode<synchronous>, transform_indices = @transform_2, window_bounds = array<i64: 512, 512>}, {transform_indices = @transform_3, window_bounds = array<i64: 16, 512>}]} {
    %c0 = arith.constant 0 : index
    %c0_0 = arith.constant 0 : index
    %0 = vector.load %arg1[%c0, %c0_0] : memref<16x512xf32, #tpu.memory_space<vmem>>, vector<16x512xf32>
    %1 = arith.truncf %0 : vector<16x512xf32> to vector<16x512xbf16>
    %c0_1 = arith.constant 0 : index
    %c0_2 = arith.constant 0 : index
    %2 = vector.load %arg2[%c0_1, %c0_2] : memref<512x512xbf16, #tpu.memory_space<vmem>>, vector<512x512xbf16>
    %cst = arith.constant dense<0.000000e+00> : vector<16x512xf32>
    %3 = tpu.matmul %1, %2, %cst {dimension_numbers = #tpu.dot_dimension_numbers<[1], [0], [0], [1], [0, 0, 1, 1], [], []>} : vector<16x512xbf16>, vector<512x512xbf16>, vector<16x512xf32> -> vector<16x512xf32>
    %cst_3 = arith.constant 0.000000e+00 : f32
    %4 = vector.broadcast %cst_3 : f32 to vector<16x512xf32>
    %5 = arith.maximumf %3, %4 : vector<16x512xf32>
    %6 = arith.truncf %5 : vector<16x512xf32> to vector<16x512xbf16>
    %c0_4 = arith.constant 0 : index
    %c0_5 = arith.constant 0 : index
    %7 = vector.load %arg3[%c0_4, %c0_5] : memref<512x512xbf16, #tpu.memory_space<vmem>>, vector<512x512xbf16>
    %cst_6 = arith.constant dense<0.000000e+00> : vector<16x512xf32>
    %8 = tpu.matmul %6, %7, %cst_6 {dimension_numbers = #tpu.dot_dimension_numbers<[1], [0], [0], [1], [0, 0, 1, 1], [], []>} : vector<16x512xbf16>, vector<512x512xbf16>, vector<16x512xf32> -> vector<16x512xf32>
    %cst_7 = arith.constant 0.000000e+00 : f32
    %9 = vector.broadcast %cst_7 : f32 to vector<16x512xf32>
    %10 = arith.maximumf %8, %9 : vector<16x512xf32>
    %c0_8 = arith.constant 0 : index
    %c0_9 = arith.constant 0 : index
    %11 = vector.load %arg1[%c0_8, %c0_9] : memref<16x512xf32, #tpu.memory_space<vmem>>, vector<16x512xf32>
    %12 = arith.addf %11, %10 : vector<16x512xf32>
    %c0_10 = arith.constant 0 : index
    %c0_11 = arith.constant 0 : index
    %13 = vector.load %arg4[%c0_10, %c0_11] : memref<16x512xf32, #tpu.memory_space<vmem>>, vector<16x512xf32>
    tpu.vector_store %arg4[%c0_10, %c0_11], %12 {strides = array<i32>} : memref<16x512xf32, #tpu.memory_space<vmem>>, vector<16x512xf32>,
    return
  }
  func.func @transform_0(%arg0: i32) -> (i32, i32) {
    %c0_i32 = arith.constant 0 : i32
    %c0_i32_0 = arith.constant 0 : i32
    return %arg0, %c0_i32 : i32, i32
  }
  func.func @transform_1(%arg0: i32) -> (i32, i32) {
    %c0_i32 = arith.constant 0 : i32
    %c0_i32_0 = arith.constant 0 : i32
    %c0_i32_1 = arith.constant 0 : i32
    return %c0_i32, %c0_i32_0 : i32, i32
  }
  func.func @transform_2(%arg0: i32) -> (i32, i32) {
    %c0_i32 = arith.constant 0 : i32
    %c0_i32_0 = arith.constant 0 : i32
    %c0_i32_1 = arith.constant 0 : i32
    return %c0_i32, %c0_i32_0 : i32, i32
  }
  func.func @transform_3(%arg0: i32) -> (i32, i32) {
    %c0_i32 = arith.constant 0 : i32
    %c0_i32_0 = arith.constant 0 : i32
    return %arg0, %c0_i32 : i32, i32
  }
}

</mosaic_0001>

<bundles_post_ra>
// kernel: tpu_custom_call.1
= control target key start
LH: loop header
LB: loop body
LE: loop exit
PB: predicated region body
PF: predicated region fallthrough
CT: control target
= control target key end

     0   :  { %8 = vsyncpa [#allocation3], 0  ;;  %s2866_s0 = inlined_call_operand.hbm [shape: f32[16,512], index: 0, kind: input, shape index: {}]   ;;  %s2867_s1 = inlined_call_operand.hbm [shape: bf16[512,512], index: 1, kind: input, shape index: {}]   ;;  %s2868_s2 = inlined_call_operand.hbm [shape: bf16[512,512], index: 2, kind: input, shape index: {}]   ;;  %s2869_s3 = inlined_call_operand.hbm [shape: f32[16,512], index: 3, kind: output, shape index: {}]  }
   0x1   :  { %9 = vsyncpa [#allocation6], 0 }
   0x2   :  { %10 = vsyncpa [#allocation4], 0  ;;  %s2766_s12 = smov [#allocation5]   ;;  %s2672_s16 = scalar_lea.hbm %s2867_s1, 16384 }
   0x3   :  { %s28_s13 = sshll.u32 %s2766_s12, 4  ;;  %p2673_p0 = scmp.ne.s32.totalorder %s2867_s1, %s2672_s16  ;;  %s29_s13 = int_to_ptr.vmem [resolvable:$true] %s28_s13 }
   0x4   :  { %p2676_p1 = scmp.lt.u32.totalorder %s2672_s16, %s2867_s1 }
   0x6   :  { %p2678_p2 = pnand %p2676_p1, %p2673_p0 }
   0x8   :  { %2681 = shalt.err (!%p2678_p2)
}
   0x9   :  { %s2682_s21 = scalar_lea.vmem %s29_s13, 16384  ;;  %p2687_p4 = scmp.lt.s32.totalorder %s29_s13, %s29_s13 }
   0xa   :  { %p2683_p3 = scmp.ne.s32.totalorder %s29_s13, %s2682_s21  ;;  %p2688_p5 = scmp.lt.s32.totalorder %s2682_s21, %s2682_s21 }
   0xc   :  { %p2689_p6 = por %p2688_p5, %p2687_p4 }
   0xe   :  { %p2690_p7 = pnand %p2689_p6, %p2683_p3 }
  0x10   :  { %2693 = shalt.err (!%p2690_p7)
}
  0x11   :  { %s2767_s22 = smov 256   ;;  %s2768_s23 = smov 16  }
  0x12   :  { %34 = dma.hbm_to_vmem [thread:$0]  %s2867_s1, 16384, %s29_s13, [#allocation6], %s2767_s22, %s2767_s22, %s2768_s23  }
  0x13   :  { %s2769_s26 = smov [#allocation2]   ;;  %s2694_s30 = scalar_lea.hbm %s2866_s0, 1024 }
  0x14   :  { %s16_s27 = sshll.u32 %s2769_s26, 4  ;;  %p2695_p8 = scmp.ne.s32.totalorder %s2866_s0, %s2694_s30  ;;  %s17_s27 = int_to_ptr.vmem [resolvable:$true] %s16_s27 }
  0x15   :  { %p2698_p9 = scmp.lt.u32.totalorder %s2694_s30, %s2866_s0 }
  0x17   :  { %p2700_p10 = pnand %p2698_p9, %p2695_p8 }
  0x19   :  { %2703 = shalt.err (!%p2700_p10)
}
  0x1a   :  { %s2704_s8 = scalar_lea.vmem %s17_s27, 1024  ;;  %p2709_p12 = scmp.lt.s32.totalorder %s17_s27, %s17_s27 }
  0x1b   :  { %p2705_p11 = scmp.ne.s32.totalorder %s17_s27, %s2704_s8  ;;  %p2710_p13 = scmp.lt.s32.totalorder %s2704_s8, %s2704_s8 }
  0x1d   :  { %p2711_p0 = por %p2710_p13, %p2709_p12 }
  0x1f   :  { %p2712_p1 = pnand %p2711_p0, %p2705_p11 }
  0x21   :  { %2715 = shalt.err (!%p2712_p1)
}
  0x22   :  { %s2770_s1 = smov 512   ;;  %s2771_s9 = smov 32  }
  0x23   :  { %22 = dma.hbm_to_vmem [thread:$0]  %s2866_s0, 1024, %s17_s27, [#allocation3], %s2770_s1, %s2770_s1, %s2771_s9  }
  0x24   :  { %s2772_s12 = smov [#allocation7]   ;;  %s2716_s16 = scalar_lea.hbm %s2868_s2, 16384 }
  0x25   :  { %s40_s13 = sshll.u32 %s2772_s12, 4  ;;  %p2717_p2 = scmp.ne.s32.totalorder %s2868_s2, %s2716_s16  ;;  %s41_s13 = int_to_ptr.vmem [resolvable:$true] %s40_s13 }
  0x26   :  { %p2720_p3 = scmp.lt.u32.totalorder %s2716_s16, %s2868_s2 }
  0x28   :  { %p2722_p4 = pnand %p2720_p3, %p2717_p2 }
  0x2a   :  { %2725 = shalt.err (!%p2722_p4)
}
  0x2b   :  { %s2726_s21 = scalar_lea.vmem %s41_s13, 16384  ;;  %p2731_p6 = scmp.lt.s32.totalorder %s41_s13, %s41_s13 }
  0x2c   :  { %p2727_p5 = scmp.ne.s32.totalorder %s41_s13, %s2726_s21  ;;  %p2732_p7 = scmp.lt.s32.totalorder %s2726_s21, %s2726_s21 }
  0x2e   :  { %p2733_p8 = por %p2732_p7, %p2731_p6 }
  0x30   :  { %p2734_p9 = pnand %p2733_p8, %p2727_p5 }
  0x32   :  { %2737 = shalt.err (!%p2734_p9)
}
  0x33   :  { %46 = dma.hbm_to_vmem [thread:$0]  %s2868_s2, 16384, %s41_s13, [#allocation6], %s2767_s22, %s2767_s22, %s2768_s23  }
  0x34   :  { %2760 = dma.done.wait [#allocation3], 1024  }
  0x35   :  { %2761 = vsyncadd [#allocation3], 4294966272 }
  0x36   :  { %2762 = dma.done.wait [#allocation6], 32768  }
  0x37   :  { %2763 = vsyncadd [#allocation6], 4294934528  ;;  %v2282_v0 = vld [vmem:[#allocation5 + $0x4] ss:$16 sps:$4 sm:$0xff]   ;;  %v2284_v1 = vld [vmem:[#allocation5 + $0xc] ss:$16 sps:$4 sm:$0xff]  }
  0x38   :  { %836 = vmatprep.subr.bf16.mxu0 %v2282_v0  ;;  %v2286_v2 = vld [vmem:[#allocation5] ss:$16 sps:$4 sm:$0xff]   ;;  %v2287_v3 = vld [vmem:[#allocation5 + $0x8] ss:$16 sps:$4 sm:$0xff]   ;;  %922 = vmatprep.subr.bf16.mxu1 %v2284_v1  ;;  %v2288_v4 = vld [vmem:[#allocation5 + $0x24] ss:$16 sps:$4 sm:$0xff]  }
  0x39   :  { %837 = vmatpush1.bf16.msra.mxu0 %v2286_v2  ;;  %923 = vmatpush1.bf16.msra.mxu1 %v2287_v3  ;;  %v2290_v5 = vld [vmem:[#allocation5 + $0x2c] ss:$16 sps:$4 sm:$0xff]   ;;  %v2292_v6 = vld [vmem:[#allocation5 + $0x20] ss:$16 sps:$4 sm:$0xff]   ;;  %v2293_v7 = vld [vmem:[#allocation5 + $0x28] ss:$16 sps:$4 sm:$0xff]  }
  0x3a   :  { %838 = vmatprep.subr.bf16.mxu0 %v2288_v4  ;;  %924 = vmatprep.subr.bf16.mxu1 %v2290_v5  ;;  %v2294_v8 = vld [vmem:[#allocation5 + $0x44] ss:$16 sps:$4 sm:$0xff]   ;;  %v2296_v9 = vld [vmem:[#allocation5 + $0x4c] ss:$16 sps:$4 sm:$0xff]   ;;  %v2298_v10 = vld [vmem:[#allocation5 + $0x40] ss:$16 sps:$4 sm:$0xff]  }
  0x3b   :  { %v2299_v11 = vld [vmem:[#allocation5 + $0x48] ss:$16 sps:$4 sm:$0xff]   ;;  %v2300_v12 = vld [vmem:[#allocation5 + $0x64] ss:$16 sps:$4 sm:$0xff]   ;;  %v2302_v13 = vld [vmem:[#allocation5 + $0x6c] ss:$16 sps:$4 sm:$0xff]  }
  0x3c   :  { %v2304_v14 = vld [vmem:[#allocation5 + $0x60] ss:$16 sps:$4 sm:$0xff]   ;;  %v2305_v15 = vld [vmem:[#allocation5 + $0x68] ss:$16 sps:$4 sm:$0xff]   ;;  %v2306_v16 = vld [vmem:[#allocation5 + $0x84] ss:$16 sps:$4 sm:$0xff]  }
  0x3d   :  { %839 = vmatpush1.bf16.msra.mxu0 %v2292_v6  ;;  %925 = vmatpush1.bf16.msra.mxu1 %v2293_v7  ;;  %v2308_v17 = vld [vmem:[#allocation5 + $0x8c] ss:$16 sps:$4 sm:$0xff]   ;;  %v2310_v18 = vld [vmem:[#allocation5 + $0x80] ss:$16 sps:$4 sm:$0xff]   ;;  %v2311_v19 = vld [vmem:[#allocation5 + $0x88] ss:$16 sps:$4 sm:$0xff]  }
  0x3e   :  { %840 = vmatprep.subr.bf16.mxu0 %v2294_v8  ;;  %926 = vmatprep.subr.bf16.mxu1 %v2296_v9  ;;  %v2312_v20 = vld [vmem:[#allocation5 + $0xa4] ss:$16 sps:$4 sm:$0xff]   ;;  %v2314_v21 = vld [vmem:[#allocation5 + $0xac] ss:$16 sps:$4 sm:$0xff]   ;;  %v2316_v22 = vld [vmem:[#allocation5 + $0xa0] ss:$16 sps:$4 sm:$0xff]  }
  0x3f   :  { %v2317_v23 = vld [vmem:[#allocation5 + $0xa8] ss:$16 sps:$4 sm:$0xff]   ;;  %v2318_v24 = vld [vmem:[#allocation5 + $0xc4] ss:$16 sps:$4 sm:$0xff]   ;;  %v2320_v25 = vld [vmem:[#allocation5 + $0xcc] ss:$16 sps:$4 sm:$0xff]  }
  0x40   :  { %v2322_v26 = vld [vmem:[#allocation5 + $0xc0] ss:$16 sps:$4 sm:$0xff]   ;;  %v2323_v27 = vld [vmem:[#allocation5 + $0xc8] ss:$16 sps:$4 sm:$0xff]   ;;  %v2324_v28 = vld [vmem:[#allocation5 + $0xe4] ss:$16 sps:$4 sm:$0xff]  }
  0x41   :  { %841 = vmatpush1.bf16.msra.mxu0 %v2298_v10  ;;  %927 = vmatpush1.bf16.msra.mxu1 %v2299_v11  ;;  %v2326_v29 = vld [vmem:[#allocation5 + $0xec] ss:$16 sps:$4 sm:$0xff]   ;;  %v2328_v30 = vld [vmem:[#allocation5 + $0xe0] ss:$16 sps:$4 sm:$0xff]   ;;  %v2329_v31 = vld [vmem:[#allocation5 + $0xe8] ss:$16 sps:$4 sm:$0xff]  }
  0x42   :  { %842 = vmatprep.subr.bf16.mxu0 %v2300_v12  ;;  %928 = vmatprep.subr.bf16.mxu1 %v2302_v13  ;;  %v2330_v32 = vld [vmem:[#allocation5 + $0x104] ss:$16 sps:$4 sm:$0xff]   ;;  %v2332_v33 = vld [vmem:[#allocation5 + $0x10c] ss:$16 sps:$4 sm:$0xff]   ;;  %v2334_v34 = vld [vmem:[#allocation5 + $0x100] ss:$16 sps:$4 sm:$0xff]  }
  0x43   :  { %v2335_v35 = vld [vmem:[#allocation5 + $0x108] ss:$16 sps:$4 sm:$0xff]   ;;  %v2336_v36 = vld [vmem:[#allocation5 + $0x124] ss:$16 sps:$4 sm:$0xff]   ;;  %v2338_v37 = vld [vmem:[#allocation5 + $0x12c] ss:$16 sps:$4 sm:$0xff]  }
  0x44   :  { %v2340_v38 = vld [vmem:[#allocation5 + $0x120] ss:$16 sps:$4 sm:$0xff]   ;;  %v2341_v39 = vld [vmem:[#allocation5 + $0x128] ss:$16 sps:$4 sm:$0xff]   ;;  %v2342_v40 = vld [vmem:[#allocation5 + $0x144] ss:$16 sps:$4 sm:$0xff]  }
  0x45   :  { %843 = vmatpush1.bf16.msra.mxu0 %v2304_v14  ;;  %929 = vmatpush1.bf16.msra.mxu1 %v2305_v15  ;;  %v2344_v41 = vld [vmem:[#allocation5 + $0x14c] ss:$16 sps:$4 sm:$0xff]   ;;  %v2346_v42 = vld [vmem:[#allocation5 + $0x140] ss:$16 sps:$4 sm:$0xff]   ;;  %v2347_v43 = vld [vmem:[#allocation5 + $0x148] ss:$16 sps:$4 sm:$0xff]  }
  0x46   :  { %844 = vmatprep.subr.bf16.mxu0 %v2306_v16  ;;  %930 = vmatprep.subr.bf16.mxu1 %v2308_v17  ;;  %v2348_v44 = vld [vmem:[#allocation5 + $0x164] ss:$16 sps:$4 sm:$0xff]   ;;  %v2350_v45 = vld [vmem:[#allocation5 + $0x16c] ss:$16 sps:$4 sm:$0xff]   ;;  %v2352_v48 = vld [vmem:[#allocation5 + $0x160] ss:$16 sps:$4 sm:$0xff]  }
  0x47   :  { %v57_v46 = vld [vmem:[#allocation2 + $0x8] sm:$0xff]  ;;  %v2354_v51 = vld [vmem:[#allocation5 + $0x184] ss:$16 sps:$4 sm:$0xff]   ;;  %v2358_v53 = vld [vmem:[#allocation5 + $0x180] ss:$16 sps:$4 sm:$0xff]   ;;  %s2773_s2 = smov [#allocation8]  }
  0x48   :  { %v61_v47 = vld [vmem:[#allocation2 + $0x28] sm:$0xff]  ;;  %v2360_v55 = vld [vmem:[#allocation5 + $0x1a4] ss:$16 sps:$4 sm:$0xff]   ;;  %v2364_v57 = vld [vmem:[#allocation5 + $0x1a0] ss:$16 sps:$4 sm:$0xff]   ;;  %s1989_s22 = sshll.u32 %s2773_s2, 4  ;;  %s1990_s22 = int_to_ptr.vmem [resolvable:$true] %s1989_s22 }
  0x49   :  { %845 = vmatpush1.bf16.msra.mxu0 %v2310_v18  ;;  %931 = vmatpush1.bf16.msra.mxu1 %v2311_v19  ;;  %v2353_v49 = vld [vmem:[#allocation5 + $0x168] ss:$16 sps:$4 sm:$0xff]   ;;  %v65_v50 = vpack.c.bf16 %v61_v47, %v57_v46  ;;  %v2356_v52 = vld [vmem:[#allocation5 + $0x18c] ss:$16 sps:$4 sm:$0xff]   ;;  %v2366_v59 = vld [vmem:[#allocation5 + $0x1c4] ss:$16 sps:$4 sm:$0xff]   ;;  %p2743_p11 = scmp.lt.s32.totalorder %s1990_s22, %s1990_s22 }
  0x4a   :  { %846 = vmatprep.subr.bf16.mxu0 %v2312_v20  ;;  %932 = vmatprep.subr.bf16.mxu1 %v2314_v21  ;;  %v2359_v54 = vld [vmem:[#allocation5 + $0x188] ss:$16 sps:$4 sm:$0xff]   ;;  %v2362_v56 = vld [vmem:[#allocation5 + $0x1ac] ss:$16 sps:$4 sm:$0xff]   ;;  %v2370_v61 = vld [vmem:[#allocation5 + $0x1c0] ss:$16 sps:$4 sm:$0xff]  }
  0x4b   :  { %868 = vmatprep.mubr.bf16.mxu0 %v65_v50  ;;  %954 = vmatprep.mubr.bf16.mxu1 %v65_v50  ;;  %v2365_v58 = vld [vmem:[#allocation5 + $0x1a8] ss:$16 sps:$4 sm:$0xff]   ;;  %v2368_v60 = vld [vmem:[#allocation5 + $0x1cc] ss:$16 sps:$4 sm:$0xff]   ;;  %v2372_v63 = vld [vmem:[#allocation5 + $0x1e4] ss:$16 sps:$4 sm:$0xff]  }
  0x4c   :  { %v2371_v62 = vld [vmem:[#allocation5 + $0x1c8] ss:$16 sps:$4 sm:$0xff]   ;;  %v2374_v0 = vld [vmem:[#allocation5 + $0x1ec] ss:$16 sps:$4 sm:$0xff]   ;;  %v2376_v1 = vld [vmem:[#allocation5 + $0x1e0] ss:$16 sps:$4 sm:$0xff]  }
  0x4d   :  { %847 = vmatpush1.bf16.msra.mxu0 %v2316_v22  ;;  %933 = vmatpush1.bf16.msra.mxu1 %v2317_v23  ;;  %v2377_v2 = vld [vmem:[#allocation5 + $0x1e8] ss:$16 sps:$4 sm:$0xff]   ;;  %v2380_v3 = vld [vmem:[#allocation5 + $0x204] ss:$16 sps:$4 sm:$0xff]   ;;  %v2383_v6 = vld [vmem:[#allocation5 + $0x20c] ss:$16 sps:$4 sm:$0xff]  }
  0x4e   :  { %848 = vmatprep.subr.bf16.mxu0 %v2318_v24  ;;  %934 = vmatprep.subr.bf16.mxu1 %v2320_v25  ;;  %v56_v4 = vld [vmem:[#allocation2] sm:$0xff]  ;;  %v2381_v8 = vld [vmem:[#allocation5 + $0x208] ss:$16 sps:$4 sm:$0xff]   ;;  %v2389_v11 = vld [vmem:[#allocation5 + $0x22c] ss:$16 sps:$4 sm:$0xff]   ;;  %s2738_s23 = scalar_lea.vmem %s1990_s22, 1024 }
  0x4f   :  { %v60_v5 = vld [vmem:[#allocation2 + $0x20] sm:$0xff]  ;;  %v2387_v13 = vld [vmem:[#allocation5 + $0x228] ss:$16 sps:$4 sm:$0xff]   ;;  %v2395_v15 = vld [vmem:[#allocation5 + $0x24c] ss:$16 sps:$4 sm:$0xff]   ;;  %p2739_p10 = scmp.ne.s32.totalorder %s1990_s22, %s2738_s23  ;;  %p2744_p12 = scmp.lt.s32.totalorder %s2738_s23, %s2738_s23 }
  0x50   :  { %v2378_v7 = vld [vmem:[#allocation5 + $0x200] ss:$16 sps:$4 sm:$0xff]   ;;  %v64_v9 = vpack.c.bf16 %v60_v5, %v56_v4  ;;  %v2386_v10 = vld [vmem:[#allocation5 + $0x224] ss:$16 sps:$4 sm:$0xff]   ;;  %v2393_v17 = vld [vmem:[#allocation5 + $0x248] ss:$16 sps:$4 sm:$0xff]  }
  0x51   :  { %849 = vmatpush1.bf16.msra.mxu0 %v2322_v26  ;;  %935 = vmatpush1.bf16.msra.mxu1 %v2323_v27  ;;  %v2384_v12 = vld [vmem:[#allocation5 + $0x220] ss:$16 sps:$4 sm:$0xff]   ;;  %v2392_v14 = vld [vmem:[#allocation5 + $0x244] ss:$16 sps:$4 sm:$0xff]   ;;  %v2401_v19 = vld [vmem:[#allocation5 + $0x26c] ss:$16 sps:$4 sm:$0xff]   ;;  %p2745_p13 = por %p2744_p12, %p2743_p11 }
  0x52   :  { %850 = vmatprep.subr.bf16.mxu0 %v2324_v28  ;;  %936 = vmatprep.subr.bf16.mxu1 %v2326_v29  ;;  %v2390_v16 = vld [vmem:[#allocation5 + $0x240] ss:$16 sps:$4 sm:$0xff]   ;;  %v2398_v18 = vld [vmem:[#allocation5 + $0x264] ss:$16 sps:$4 sm:$0xff]   ;;  %v2399_v21 = vld [vmem:[#allocation5 + $0x268] ss:$16 sps:$4 sm:$0xff]  }
  0x53   :  { %v2396_v20 = vld [vmem:[#allocation5 + $0x260] ss:$16 sps:$4 sm:$0xff]   ;;  %v2404_v22 = vld [vmem:[#allocation5 + $0x284] ss:$16 sps:$4 sm:$0xff]   ;;  %v2407_v23 = vld [vmem:[#allocation5 + $0x28c] ss:$16 sps:$4 sm:$0xff]   ;;  %p2746_p0 = pnand %p2745_p13, %p2739_p10 }
  0x54   :  { %v2402_v24 = vld [vmem:[#allocation5 + $0x280] ss:$16 sps:$4 sm:$0xff]   ;;  %v2405_v25 = vld [vmem:[#allocation5 + $0x288] ss:$16 sps:$4 sm:$0xff]   ;;  %v2410_v26 = vld [vmem:[#allocation5 + $0x2a4] ss:$16 sps:$4 sm:$0xff]  }
  0x55   :  { %851 = vmatpush1.bf16.msra.mxu0 %v2328_v30  ;;  %937 = vmatpush1.bf16.msra.mxu1 %v2329_v31  ;;  %v2413_v27 = vld [vmem:[#allocation5 + $0x2ac] ss:$16 sps:$4 sm:$0xff]   ;;  %v2408_v28 = vld [vmem:[#allocation5 + $0x2a0] ss:$16 sps:$4 sm:$0xff]   ;;  %v2411_v29 = vld [vmem:[#allocation5 + $0x2a8] ss:$16 sps:$4 sm:$0xff]  }
  0x56   :  { %852 = vmatprep.subr.bf16.mxu0 %v2330_v32  ;;  %938 = vmatprep.subr.bf16.mxu1 %v2332_v33  ;;  %v2416_v30 = vld [vmem:[#allocation5 + $0x2c4] ss:$16 sps:$4 sm:$0xff]   ;;  %v2419_v31 = vld [vmem:[#allocation5 + $0x2cc] ss:$16 sps:$4 sm:$0xff]   ;;  %v2414_v33 = vld [vmem:[#allocation5 + $0x2c0] ss:$16 sps:$4 sm:$0xff]  }
  0x57   :  { %v59_v32 = vld [vmem:[#allocation2 + $0x18] sm:$0xff]  ;;  %v2432_v47 = vld [vmem:[#allocation5 + $0x320] ss:$16 sps:$4 sm:$0xff]   ;;  %v2470_v5 = vld [vmem:[#allocation5 + $0x3e4] ss:$16 sps:$4 sm:$0xff]  }
  0x58   :  { %v2437_v46 = vld [vmem:[#allocation5 + $0x32c] ss:$16 sps:$4 sm:$0xff]   ;;  %v2465_v4 = vld [vmem:[#allocation5 + $0x3c8] ss:$16 sps:$4 sm:$0xff]  }
  0x59   :  { %853 = vmatpush1.bf16.msra.mxu0 %v2334_v34  ;;  %939 = vmatpush1.bf16.msra.mxu1 %v2335_v35  ;;  %v2417_v34 = vld [vmem:[#allocation5 + $0x2c8] ss:$16 sps:$4 sm:$0xff]   ;;  %v2443_v50 = vld [vmem:[#allocation5 + $0x34c] ss:$16 sps:$4 sm:$0xff]  }
  0x5a   :  { %854 = vmatprep.subr.bf16.mxu0 %v2336_v36  ;;  %940 = vmatprep.subr.bf16.mxu1 %v2338_v37  ;;  %v63_v35 = vld [vmem:[#allocation2 + $0x38] sm:$0xff]  ;;  %v2422_v36 = vld [vmem:[#allocation5 + $0x2e4] ss:$16 sps:$4 sm:$0xff]  }
  0x5b   :  { %v67_v37 = vpack.c.bf16 %v63_v35, %v59_v32  ;;  %v2506_v32 = vld [vmem:[#allocation7 + $0xa4] ss:$16 sps:$4 sm:$0xff]   ;;  %v2507_v35 = vld [vmem:[#allocation7 + $0xa8] ss:$16 sps:$4 sm:$0xff]  }
  0x5d   :  { %855 = vmatpush1.bf16.msra.mxu0 %v2340_v38  ;;  %941 = vmatpush1.bf16.msra.mxu1 %v2341_v39  ;;  %v2425_v38 = vld [vmem:[#allocation5 + $0x2ec] ss:$16 sps:$4 sm:$0xff]   ;;  %v2420_v39 = vld [vmem:[#allocation5 + $0x2e0] ss:$16 sps:$4 sm:$0xff]  }
  0x5e   :  { %856 = vmatprep.subr.bf16.mxu0 %v2342_v40  ;;  %942 = vmatprep.subr.bf16.mxu1 %v2344_v41  ;;  %v2423_v40 = vld [vmem:[#allocation5 + $0x2e8] ss:$16 sps:$4 sm:$0xff]   ;;  %v2428_v41 = vld [vmem:[#allocation5 + $0x304] ss:$16 sps:$4 sm:$0xff]  }
  0x61   :  { %857 = vmatpush1.bf16.msra.mxu0 %v2346_v42  ;;  %943 = vmatpush1.bf16.msra.mxu1 %v2347_v43  ;;  %v2431_v42 = vld [vmem:[#allocation5 + $0x30c] ss:$16 sps:$4 sm:$0xff]   ;;  %v2426_v43 = vld [vmem:[#allocation5 + $0x300] ss:$16 sps:$4 sm:$0xff]  }
  0x62   :  { %858 = vmatprep.subr.bf16.mxu0 %v2348_v44  ;;  %944 = vmatprep.subr.bf16.mxu1 %v2350_v45  ;;  %v2429_v44 = vld [vmem:[#allocation5 + $0x308] ss:$16 sps:$4 sm:$0xff]   ;;  %v2434_v45 = vld [vmem:[#allocation5 + $0x324] ss:$16 sps:$4 sm:$0xff]  }
  0x65   :  { %859 = vmatpush1.bf16.msra.mxu0 %v2352_v48  ;;  %945 = vmatpush1.bf16.msra.mxu1 %v2353_v49  ;;  %v2435_v48 = vld [vmem:[#allocation5 + $0x328] ss:$16 sps:$4 sm:$0xff]   ;;  %v2440_v49 = vld [vmem:[#allocation5 + $0x344] ss:$16 sps:$4 sm:$0xff]  }
  0x66   :  { %860 = vmatprep.subr.bf16.mxu0 %v2354_v51  ;;  %946 = vmatprep.subr.bf16.mxu1 %v2356_v52  ;;  %v2438_v51 = vld [vmem:[#allocation5 + $0x340] ss:$16 sps:$4 sm:$0xff]   ;;  %v2441_v52 = vld [vmem:[#allocation5 + $0x348] ss:$16 sps:$4 sm:$0xff]  }
  0x69   :  { %861 = vmatpush1.bf16.msra.mxu0 %v2358_v53  ;;  %947 = vmatpush1.bf16.msra.mxu1 %v2359_v54  ;;  %v2446_v53 = vld [vmem:[#allocation5 + $0x364] ss:$16 sps:$4 sm:$0xff]   ;;  %v2449_v54 = vld [vmem:[#allocation5 + $0x36c] ss:$16 sps:$4 sm:$0xff]  }
  0x6a   :  { %862 = vmatprep.subr.bf16.mxu0 %v2360_v55  ;;  %948 = vmatprep.subr.bf16.mxu1 %v2362_v56  ;;  %v2444_v55 = vld [vmem:[#allocation5 + $0x360] ss:$16 sps:$4 sm:$0xff]   ;;  %v2447_v56 = vld [vmem:[#allocation5 + $0x368] ss:$16 sps:$4 sm:$0xff]  }
  0x6d   :  { %863 = vmatpush1.bf16.msra.mxu0 %v2364_v57  ;;  %949 = vmatpush1.bf16.msra.mxu1 %v2365_v58  ;;  %v2452_v57 = vld [vmem:[#allocation5 + $0x384] ss:$16 sps:$4 sm:$0xff]   ;;  %v2455_v58 = vld [vmem:[#allocation5 + $0x38c] ss:$16 sps:$4 sm:$0xff]  }
  0x6e   :  { %864 = vmatprep.subr.bf16.mxu0 %v2366_v59  ;;  %950 = vmatprep.subr.bf16.mxu1 %v2368_v60  ;;  %v2450_v59 = vld [vmem:[#allocation5 + $0x380] ss:$16 sps:$4 sm:$0xff]   ;;  %v2453_v60 = vld [vmem:[#allocation5 + $0x388] ss:$16 sps:$4 sm:$0xff]  }
  0x71   :  { %865 = vmatpush1.bf16.msra.mxu0 %v2370_v61  ;;  %951 = vmatpush1.bf16.msra.mxu1 %v2371_v62  ;;  %v2458_v61 = vld [vmem:[#allocation5 + $0x3a4] ss:$16 sps:$4 sm:$0xff]   ;;  %v2461_v62 = vld [vmem:[#allocation5 + $0x3ac] ss:$16 sps:$4 sm:$0xff]  }
  0x72   :  { %866 = vmatprep.subr.bf16.mxu0 %v2372_v63  ;;  %952 = vmatprep.subr.bf16.mxu1 %v2374_v0  ;;  %v2456_v63 = vld [vmem:[#allocation5 + $0x3a0] ss:$16 sps:$4 sm:$0xff]   ;;  %v2459_v0 = vld [vmem:[#allocation5 + $0x3a8] ss:$16 sps:$4 sm:$0xff]  }
  0x75   :  { %867 = vmatpush1.bf16.msra.mxu0 %v2376_v1  ;;  %953 = vmatpush1.bf16.msra.mxu1 %v2377_v2  ;;  %v2464_v1 = vld [vmem:[#allocation5 + $0x3c4] ss:$16 sps:$4 sm:$0xff]   ;;  %v2467_v2 = vld [vmem:[#allocation5 + $0x3cc] ss:$16 sps:$4 sm:$0xff]  }
  0x76   :  { %879 = vmatprep.subr.bf16.mxu0 %v2380_v3  ;;  %965 = vmatprep.subr.bf16.mxu1 %v2383_v6  ;;  %v2462_v3 = vld [vmem:[#allocation5 + $0x3c0] ss:$16 sps:$4 sm:$0xff]   ;;  %v2473_v6 = vld [vmem:[#allocation5 + $0x3ec] ss:$16 sps:$4 sm:$0xff]  }
  0x78   :  { %869 = vmatmul.mubr.bf16.vlgmr.msra.gmra.mrb[0].mxu0 %v64_v9  ;;  %955 = vmatmul.mubr.bf16.vlgmr.msra.gmra.mrb[0].mxu1 %v64_v9  ;;  %v2839_v9 = vld [vmem:[#allocation2 + $0x10] sm:$0xff] }
  0x79   :  { %880 = vmatpush1.bf16.msra.mxu0 %v2378_v7  ;;  %966 = vmatpush1.bf16.msra.mxu1 %v2381_v8  ;;  %v2468_v7 = vld [vmem:[#allocation5 + $0x3e0] ss:$16 sps:$4 sm:$0xff]   ;;  %v2471_v8 = vld [vmem:[#allocation5 + $0x3e8] ss:$16 sps:$4 sm:$0xff]  }
  0x7a   :  { %881 = vmatprep.subr.bf16.mxu0 %v2386_v10  ;;  %967 = vmatprep.subr.bf16.mxu1 %v2389_v11  ;;  %v2841_v10 = vld [vmem:[#allocation2 + $0x30] sm:$0xff] }
  0x7b   :  { %911 = vmatprep.mubr.bf16.mxu0 %v67_v37  ;;  %997 = vmatprep.mubr.bf16.mxu1 %v67_v37  ;;  %v2476_v11 = vld [vmem:[#allocation7 + $0x4] ss:$16 sps:$4 sm:$0xff]   ;;  %v2515_v37 = vld [vmem:[#allocation7 + $0xcc] ss:$16 sps:$4 sm:$0xff]  }
  0x7d   :  { %882 = vmatpush1.bf16.msra.mxu0 %v2384_v12  ;;  %968 = vmatpush1.bf16.msra.mxu1 %v2387_v13  ;;  %v2479_v12 = vld [vmem:[#allocation7 + $0xc] ss:$16 sps:$4 sm:$0xff]   ;;  %v2474_v13 = vld [vmem:[#allocation7] ss:$16 sps:$4 sm:$0xff]  }
  0x7e   :  { %883 = vmatprep.subr.bf16.mxu0 %v2392_v14  ;;  %969 = vmatprep.subr.bf16.mxu1 %v2395_v15  ;;  %v2477_v14 = vld [vmem:[#allocation7 + $0x8] ss:$16 sps:$4 sm:$0xff]   ;;  %v66_v15 = vpack.c.bf16 %v2841_v10, %v2839_v9 }
  0x81   :  { %884 = vmatpush1.bf16.msra.mxu0 %v2390_v16  ;;  %970 = vmatpush1.bf16.msra.mxu1 %v2393_v17  ;;  %v2482_v16 = vld [vmem:[#allocation7 + $0x24] ss:$16 sps:$4 sm:$0xff]   ;;  %v2485_v17 = vld [vmem:[#allocation7 + $0x2c] ss:$16 sps:$4 sm:$0xff]  }
  0x82   :  { %885 = vmatprep.subr.bf16.mxu0 %v2398_v18  ;;  %971 = vmatprep.subr.bf16.mxu1 %v2401_v19  ;;  %v2480_v18 = vld [vmem:[#allocation7 + $0x20] ss:$16 sps:$4 sm:$0xff]   ;;  %v2483_v19 = vld [vmem:[#allocation7 + $0x28] ss:$16 sps:$4 sm:$0xff]  }
  0x85   :  { %886 = vmatpush1.bf16.msra.mxu0 %v2396_v20  ;;  %972 = vmatpush1.bf16.msra.mxu1 %v2399_v21  ;;  %v2488_v20 = vld [vmem:[#allocation7 + $0x44] ss:$16 sps:$4 sm:$0xff]   ;;  %v2491_v21 = vld [vmem:[#allocation7 + $0x4c] ss:$16 sps:$4 sm:$0xff]  }
  0x86   :  { %887 = vmatprep.subr.bf16.mxu0 %v2404_v22  ;;  %973 = vmatprep.subr.bf16.mxu1 %v2407_v23  ;;  %v2486_v22 = vld [vmem:[#allocation7 + $0x40] ss:$16 sps:$4 sm:$0xff]   ;;  %v2489_v23 = vld [vmem:[#allocation7 + $0x48] ss:$16 sps:$4 sm:$0xff]  }
  0x89   :  { %888 = vmatpush1.bf16.msra.mxu0 %v2402_v24  ;;  %974 = vmatpush1.bf16.msra.mxu1 %v2405_v25  ;;  %v2494_v24 = vld [vmem:[#allocation7 + $0x64] ss:$16 sps:$4 sm:$0xff]   ;;  %v2497_v25 = vld [vmem:[#allocation7 + $0x6c] ss:$16 sps:$4 sm:$0xff]  }
  0x8a   :  { %889 = vmatprep.subr.bf16.mxu0 %v2410_v26  ;;  %975 = vmatprep.subr.bf16.mxu1 %v2413_v27  ;;  %v2492_v26 = vld [vmem:[#allocation7 + $0x60] ss:$16 sps:$4 sm:$0xff]   ;;  %v2495_v27 = vld [vmem:[#allocation7 + $0x68] ss:$16 sps:$4 sm:$0xff]  }
  0x8d   :  { %890 = vmatpush1.bf16.msra.mxu0 %v2408_v28  ;;  %976 = vmatpush1.bf16.msra.mxu1 %v2411_v29  ;;  %v2500_v28 = vld [vmem:[#allocation7 + $0x84] ss:$16 sps:$4 sm:$0xff]   ;;  %v2503_v29 = vld [vmem:[#allocation7 + $0x8c] ss:$16 sps:$4 sm:$0xff]  }
  0x8e   :  { %891 = vmatprep.subr.bf16.mxu0 %v2416_v30  ;;  %977 = vmatprep.subr.bf16.mxu1 %v2419_v31  ;;  %v2498_v30 = vld [vmem:[#allocation7 + $0x80] ss:$16 sps:$4 sm:$0xff]   ;;  %v2501_v31 = vld [vmem:[#allocation7 + $0x88] ss:$16 sps:$4 sm:$0xff]  }
  0x91   :  { %892 = vmatpush1.bf16.msra.mxu0 %v2414_v33  ;;  %978 = vmatpush1.bf16.msra.mxu1 %v2417_v34  ;;  %v2509_v33 = vld [vmem:[#allocation7 + $0xac] ss:$16 sps:$4 sm:$0xff]   ;;  %v2504_v34 = vld [vmem:[#allocation7 + $0xa0] ss:$16 sps:$4 sm:$0xff]  }
  0x92   :  { %893 = vmatprep.subr.bf16.mxu0 %v2422_v36  ;;  %979 = vmatprep.subr.bf16.mxu1 %v2425_v38  ;;  %v2512_v36 = vld [vmem:[#allocation7 + $0xc4] ss:$16 sps:$4 sm:$0xff]   ;;  %v2510_v38 = vld [vmem:[#allocation7 + $0xc0] ss:$16 sps:$4 sm:$0xff]  }
  0x95   :  { %894 = vmatpush1.bf16.msra.mxu0 %v2420_v39  ;;  %980 = vmatpush1.bf16.msra.mxu1 %v2423_v40  ;;  %v2513_v39 = vld [vmem:[#allocation7 + $0xc8] ss:$16 sps:$4 sm:$0xff]   ;;  %v2518_v40 = vld [vmem:[#allocation7 + $0xe4] ss:$16 sps:$4 sm:$0xff]  }
  0x96   :  { %895 = vmatprep.subr.bf16.mxu0 %v2428_v41  ;;  %981 = vmatprep.subr.bf16.mxu1 %v2431_v42  ;;  %v2521_v41 = vld [vmem:[#allocation7 + $0xec] ss:$16 sps:$4 sm:$0xff]   ;;  %v2516_v42 = vld [vmem:[#allocation7 + $0xe0] ss:$16 sps:$4 sm:$0xff]  }
  0x99   :  { %896 = vmatpush1.bf16.msra.mxu0 %v2426_v43  ;;  %982 = vmatpush1.bf16.msra.mxu1 %v2429_v44  ;;  %v2519_v43 = vld [vmem:[#allocation7 + $0xe8] ss:$16 sps:$4 sm:$0xff]   ;;  %v2524_v44 = vld [vmem:[#allocation7 + $0x104] ss:$16 sps:$4 sm:$0xff]  }
  0x9a   :  { %897 = vmatprep.subr.bf16.mxu0 %v2434_v45  ;;  %983 = vmatprep.subr.bf16.mxu1 %v2437_v46  ;;  %v2527_v45 = vld [vmem:[#allocation7 + $0x10c] ss:$16 sps:$4 sm:$0xff]   ;;  %v2522_v46 = vld [vmem:[#allocation7 + $0x100] ss:$16 sps:$4 sm:$0xff]  }
  0x9d   :  { %898 = vmatpush1.bf16.msra.mxu0 %v2432_v47  ;;  %984 = vmatpush1.bf16.msra.mxu1 %v2435_v48  ;;  %v2525_v47 = vld [vmem:[#allocation7 + $0x108] ss:$16 sps:$4 sm:$0xff]   ;;  %v2530_v48 = vld [vmem:[#allocation7 + $0x124] ss:$16 sps:$4 sm:$0xff]  }
  0x9e   :  { %899 = vmatprep.subr.bf16.mxu0 %v2440_v49  ;;  %985 = vmatprep.subr.bf16.mxu1 %v2443_v50  ;;  %v2533_v49 = vld [vmem:[#allocation7 + $0x12c] ss:$16 sps:$4 sm:$0xff]   ;;  %v2528_v50 = vld [vmem:[#allocation7 + $0x120] ss:$16 sps:$4 sm:$0xff]  }
  0xa1   :  { %900 = vmatpush1.bf16.msra.mxu0 %v2438_v51  ;;  %986 = vmatpush1.bf16.msra.mxu1 %v2441_v52  ;;  %v2531_v51 = vld [vmem:[#allocation7 + $0x128] ss:$16 sps:$4 sm:$0xff]   ;;  %v2536_v52 = vld [vmem:[#allocation7 + $0x144] ss:$16 sps:$4 sm:$0xff]  }
  0xa2   :  { %901 = vmatprep.subr.bf16.mxu0 %v2446_v53  ;;  %987 = vmatprep.subr.bf16.mxu1 %v2449_v54  ;;  %v2539_v53 = vld [vmem:[#allocation7 + $0x14c] ss:$16 sps:$4 sm:$0xff]   ;;  %v2534_v54 = vld [vmem:[#allocation7 + $0x140] ss:$16 sps:$4 sm:$0xff]  }
  0xa5   :  { %902 = vmatpush1.bf16.msra.mxu0 %v2444_v55  ;;  %988 = vmatpush1.bf16.msra.mxu1 %v2447_v56  ;;  %v2537_v55 = vld [vmem:[#allocation7 + $0x148] ss:$16 sps:$4 sm:$0xff]   ;;  %v2542_v56 = vld [vmem:[#allocation7 + $0x164] ss:$16 sps:$4 sm:$0xff]  }
  0xa6   :  { %903 = vmatprep.subr.bf16.mxu0 %v2452_v57  ;;  %989 = vmatprep.subr.bf16.mxu1 %v2455_v58  ;;  %v2545_v57 = vld [vmem:[#allocation7 + $0x16c] ss:$16 sps:$4 sm:$0xff]   ;;  %v2540_v58 = vld [vmem:[#allocation7 + $0x160] ss:$16 sps:$4 sm:$0xff]  }
  0xa9   :  { %904 = vmatpush1.bf16.msra.mxu0 %v2450_v59  ;;  %990 = vmatpush1.bf16.msra.mxu1 %v2453_v60  ;;  %v2543_v59 = vld [vmem:[#allocation7 + $0x168] ss:$16 sps:$4 sm:$0xff]   ;;  %v2548_v60 = vld [vmem:[#allocation7 + $0x184] ss:$16 sps:$4 sm:$0xff]  }
  0xaa   :  { %905 = vmatprep.subr.bf16.mxu0 %v2458_v61  ;;  %991 = vmatprep.subr.bf16.mxu1 %v2461_v62  ;;  %v2551_v61 = vld [vmem:[#allocation7 + $0x18c] ss:$16 sps:$4 sm:$0xff]   ;;  %v2546_v62 = vld [vmem:[#allocation7 + $0x180] ss:$16 sps:$4 sm:$0xff]  }
  0xad   :  { %906 = vmatpush1.bf16.msra.mxu0 %v2456_v63  ;;  %992 = vmatpush1.bf16.msra.mxu1 %v2459_v0  ;;  %v2549_v63 = vld [vmem:[#allocation7 + $0x188] ss:$16 sps:$4 sm:$0xff]   ;;  %v2554_v0 = vld [vmem:[#allocation7 + $0x1a4] ss:$16 sps:$4 sm:$0xff]  }
  0xae   :  { %907 = vmatprep.subr.bf16.mxu0 %v2464_v1  ;;  %993 = vmatprep.subr.bf16.mxu1 %v2467_v2  ;;  %v2557_v1 = vld [vmem:[#allocation7 + $0x1ac] ss:$16 sps:$4 sm:$0xff]   ;;  %v2552_v2 = vld [vmem:[#allocation7 + $0x1a0] ss:$16 sps:$4 sm:$0xff]  }
  0xb1   :  { %908 = vmatpush1.bf16.msra.mxu0 %v2462_v3  ;;  %994 = vmatpush1.bf16.msra.mxu1 %v2465_v4  ;;  %v2555_v3 = vld [vmem:[#allocation7 + $0x1a8] ss:$16 sps:$4 sm:$0xff]   ;;  %v2560_v4 = vld [vmem:[#allocation7 + $0x1c4] ss:$16 sps:$4 sm:$0xff]  }
  0xb2   :  { %909 = vmatprep.subr.bf16.mxu0 %v2470_v5  ;;  %995 = vmatprep.subr.bf16.mxu1 %v2473_v6  ;;  %v2563_v5 = vld [vmem:[#allocation7 + $0x1cc] ss:$16 sps:$4 sm:$0xff]   ;;  %v2558_v6 = vld [vmem:[#allocation7 + $0x1c0] ss:$16 sps:$4 sm:$0xff]  }
  0xb5   :  { %910 = vmatpush1.bf16.msra.mxu0 %v2468_v7  ;;  %996 = vmatpush1.bf16.msra.mxu1 %v2471_v8  ;;  %v2561_v7 = vld [vmem:[#allocation7 + $0x1c8] ss:$16 sps:$4 sm:$0xff]   ;;  %v2566_v8 = vld [vmem:[#allocation7 + $0x1e4] ss:$16 sps:$4 sm:$0xff]  }
  0xb6   :  { %1788 = vmatprep.subr.bf16.mxu0 %v2476_v11  ;;  %1874 = vmatprep.subr.bf16.mxu1 %v2479_v12  ;;  %v2569_v11 = vld [vmem:[#allocation7 + $0x1ec] ss:$16 sps:$4 sm:$0xff]   ;;  %v2564_v12 = vld [vmem:[#allocation7 + $0x1e0] ss:$16 sps:$4 sm:$0xff]  }
  0xb8   :  { %912 = vmatmul.mubr.bf16.vlgmr.msra.gmra.mrb[0].mxu0 %v66_v15  ;;  %998 = vmatmul.mubr.bf16.vlgmr.msra.gmra.mrb[0].mxu1 %v66_v15  ;;  %v2575_v15 = vld [vmem:[#allocation7 + $0x20c] ss:$16 sps:$4 sm:$0xff]  }
  0xb9   :  { %1789 = vmatpush1.bf16.msra.mxu0 %v2474_v13  ;;  %1875 = vmatpush1.bf16.msra.mxu1 %v2477_v14  ;;  %v2567_v13 = vld [vmem:[#allocation7 + $0x1e8] ss:$16 sps:$4 sm:$0xff]   ;;  %v2572_v14 = vld [vmem:[#allocation7 + $0x204] ss:$16 sps:$4 sm:$0xff]  }
  0xba   :  { %1790 = vmatprep.subr.bf16.mxu0 %v2482_v16  ;;  %1876 = vmatprep.subr.bf16.mxu1 %v2485_v17 }
  0xbd   :  { %1791 = vmatpush1.bf16.msra.mxu0 %v2480_v18  ;;  %1877 = vmatpush1.bf16.msra.mxu1 %v2483_v19 }
  0xbe   :  { %1792 = vmatprep.subr.bf16.mxu0 %v2488_v20  ;;  %1878 = vmatprep.subr.bf16.mxu1 %v2491_v21 }
  0xc1   :  { %1793 = vmatpush1.bf16.msra.mxu0 %v2486_v22  ;;  %1879 = vmatpush1.bf16.msra.mxu1 %v2489_v23 }
  0xc2   :  { %1794 = vmatprep.subr.bf16.mxu0 %v2494_v24  ;;  %1880 = vmatprep.subr.bf16.mxu1 %v2497_v25 }
  0xc5   :  { %1795 = vmatpush1.bf16.msra.mxu0 %v2492_v26  ;;  %1881 = vmatpush1.bf16.msra.mxu1 %v2495_v27 }
  0xc6   :  { %1796 = vmatprep.subr.bf16.mxu0 %v2500_v28  ;;  %1882 = vmatprep.subr.bf16.mxu1 %v2503_v29 }
  0xc9   :  { %1797 = vmatpush1.bf16.msra.mxu0 %v2498_v30  ;;  %1883 = vmatpush1.bf16.msra.mxu1 %v2501_v31 }
  0xca   :  { %1798 = vmatprep.subr.bf16.mxu0 %v2506_v32  ;;  %1884 = vmatprep.subr.bf16.mxu1 %v2509_v33 }
  0xcd   :  { %1799 = vmatpush1.bf16.msra.mxu0 %v2504_v34  ;;  %1885 = vmatpush1.bf16.msra.mxu1 %v2507_v35 }
  0xce   :  { %1800 = vmatprep.subr.bf16.mxu0 %v2512_v36  ;;  %1886 = vmatprep.subr.bf16.mxu1 %v2515_v37  ;;  %v2570_v36 = vld [vmem:[#allocation7 + $0x200] ss:$16 sps:$4 sm:$0xff]   ;;  %v2573_v37 = vld [vmem:[#allocation7 + $0x208] ss:$16 sps:$4 sm:$0xff]  }
  0xd1   :  { %1801 = vmatpush1.bf16.msra.mxu0 %v2510_v38  ;;  %1887 = vmatpush1.bf16.msra.mxu1 %v2513_v39  ;;  %v2578_v38 = vld [vmem:[#allocation7 + $0x224] ss:$16 sps:$4 sm:$0xff]   ;;  %v2581_v39 = vld [vmem:[#allocation7 + $0x22c] ss:$16 sps:$4 sm:$0xff]  }
  0xd2   :  { %1802 = vmatprep.subr.bf16.mxu0 %v2518_v40  ;;  %1888 = vmatprep.subr.bf16.mxu1 %v2521_v41  ;;  %v2576_v40 = vld [vmem:[#allocation7 + $0x220] ss:$16 sps:$4 sm:$0xff]   ;;  %v2579_v41 = vld [vmem:[#allocation7 + $0x228] ss:$16 sps:$4 sm:$0xff]  }
  0xd5   :  { %1803 = vmatpush1.bf16.msra.mxu0 %v2516_v42  ;;  %1889 = vmatpush1.bf16.msra.mxu1 %v2519_v43  ;;  %v2584_v42 = vld [vmem:[#allocation7 + $0x244] ss:$16 sps:$4 sm:$0xff]   ;;  %v2587_v43 = vld [vmem:[#allocation7 + $0x24c] ss:$16 sps:$4 sm:$0xff]  }
  0xd6   :  { %1804 = vmatprep.subr.bf16.mxu0 %v2524_v44  ;;  %1890 = vmatprep.subr.bf16.mxu1 %v2527_v45  ;;  %v2582_v44 = vld [vmem:[#allocation7 + $0x240] ss:$16 sps:$4 sm:$0xff]   ;;  %v2585_v45 = vld [vmem:[#allocation7 + $0x248] ss:$16 sps:$4 sm:$0xff]  }
  0xd9   :  { %1805 = vmatpush1.bf16.msra.mxu0 %v2522_v46  ;;  %1891 = vmatpush1.bf16.msra.mxu1 %v2525_v47  ;;  %v2590_v46 = vld [vmem:[#allocation7 + $0x264] ss:$16 sps:$4 sm:$0xff]   ;;  %v2593_v47 = vld [vmem:[#allocation7 + $0x26c] ss:$16 sps:$4 sm:$0xff]  }
  0xda   :  { %1806 = vmatprep.subr.bf16.mxu0 %v2530_v48  ;;  %1892 = vmatprep.subr.bf16.mxu1 %v2533_v49  ;;  %v2588_v48 = vld [vmem:[#allocation7 + $0x260] ss:$16 sps:$4 sm:$0xff]   ;;  %v2591_v49 = vld [vmem:[#allocation7 + $0x268] ss:$16 sps:$4 sm:$0xff]  }
  0xdd   :  { %1807 = vmatpush1.bf16.msra.mxu0 %v2528_v50  ;;  %1893 = vmatpush1.bf16.msra.mxu1 %v2531_v51  ;;  %v2596_v50 = vld [vmem:[#allocation7 + $0x284] ss:$16 sps:$4 sm:$0xff]   ;;  %v2599_v51 = vld [vmem:[#allocation7 + $0x28c] ss:$16 sps:$4 sm:$0xff]  }
  0xde   :  { %1808 = vmatprep.subr.bf16.mxu0 %v2536_v52  ;;  %1894 = vmatprep.subr.bf16.mxu1 %v2539_v53  ;;  %v2594_v52 = vld [vmem:[#allocation7 + $0x280] ss:$16 sps:$4 sm:$0xff]   ;;  %v2597_v53 = vld [vmem:[#allocation7 + $0x288] ss:$16 sps:$4 sm:$0xff]  }
  0xe1   :  { %1809 = vmatpush1.bf16.msra.mxu0 %v2534_v54  ;;  %1895 = vmatpush1.bf16.msra.mxu1 %v2537_v55  ;;  %v2602_v54 = vld [vmem:[#allocation7 + $0x2a4] ss:$16 sps:$4 sm:$0xff]   ;;  %v2605_v55 = vld [vmem:[#allocation7 + $0x2ac] ss:$16 sps:$4 sm:$0xff]  }
  0xe2   :  { %1810 = vmatprep.subr.bf16.mxu0 %v2542_v56  ;;  %1896 = vmatprep.subr.bf16.mxu1 %v2545_v57  ;;  %v2600_v56 = vld [vmem:[#allocation7 + $0x2a0] ss:$16 sps:$4 sm:$0xff]   ;;  %v2603_v57 = vld [vmem:[#allocation7 + $0x2a8] ss:$16 sps:$4 sm:$0xff]  }
  0xe5   :  { %1811 = vmatpush1.bf16.msra.mxu0 %v2540_v58  ;;  %1897 = vmatpush1.bf16.msra.mxu1 %v2543_v59  ;;  %v2608_v58 = vld [vmem:[#allocation7 + $0x2c4] ss:$16 sps:$4 sm:$0xff]   ;;  %v2611_v59 = vld [vmem:[#allocation7 + $0x2cc] ss:$16 sps:$4 sm:$0xff]  }
  0xe6   :  { %1812 = vmatprep.subr.bf16.mxu0 %v2548_v60  ;;  %1898 = vmatprep.subr.bf16.mxu1 %v2551_v61  ;;  %v2606_v60 = vld [vmem:[#allocation7 + $0x2c0] ss:$16 sps:$4 sm:$0xff]   ;;  %v2609_v61 = vld [vmem:[#allocation7 + $0x2c8] ss:$16 sps:$4 sm:$0xff]  }
  0xe9   :  { %1813 = vmatpush1.bf16.msra.mxu0 %v2546_v62  ;;  %1899 = vmatpush1.bf16.msra.mxu1 %v2549_v63  ;;  %v2614_v62 = vld [vmem:[#allocation7 + $0x2e4] ss:$16 sps:$4 sm:$0xff]   ;;  %v2617_v63 = vld [vmem:[#allocation7 + $0x2ec] ss:$16 sps:$4 sm:$0xff]  }
  0xea   :  { %1814 = vmatprep.subr.bf16.mxu0 %v2554_v0  ;;  %1900 = vmatprep.subr.bf16.mxu1 %v2557_v1  ;;  %v2612_v0 = vld [vmem:[#allocation7 + $0x2e0] ss:$16 sps:$4 sm:$0xff]   ;;  %v2615_v1 = vld [vmem:[#allocation7 + $0x2e8] ss:$16 sps:$4 sm:$0xff]  }
  0xed   :  { %1815 = vmatpush1.bf16.msra.mxu0 %v2552_v2  ;;  %1901 = vmatpush1.bf16.msra.mxu1 %v2555_v3  ;;  %v2620_v2 = vld [vmem:[#allocation7 + $0x304] ss:$16 sps:$4 sm:$0xff]   ;;  %v2623_v3 = vld [vmem:[#allocation7 + $0x30c] ss:$16 sps:$4 sm:$0xff]  }
  0xee   :  { %1816 = vmatprep.subr.bf16.mxu0 %v2560_v4  ;;  %1902 = vmatprep.subr.bf16.mxu1 %v2563_v5  ;;  %v2618_v4 = vld [vmem:[#allocation7 + $0x300] ss:$16 sps:$4 sm:$0xff]   ;;  %v2621_v5 = vld [vmem:[#allocation7 + $0x308] ss:$16 sps:$4 sm:$0xff]  }
  0xf1   :  { %1817 = vmatpush1.bf16.msra.mxu0 %v2558_v6  ;;  %1903 = vmatpush1.bf16.msra.mxu1 %v2561_v7  ;;  %v2626_v6 = vld [vmem:[#allocation7 + $0x324] ss:$16 sps:$4 sm:$0xff]   ;;  %v2629_v7 = vld [vmem:[#allocation7 + $0x32c] ss:$16 sps:$4 sm:$0xff]  }
  0xf2   :  { %1818 = vmatprep.subr.bf16.mxu0 %v2566_v8  ;;  %1904 = vmatprep.subr.bf16.mxu1 %v2569_v11  ;;  %v2624_v8 = vld [vmem:[#allocation7 + $0x320] ss:$16 sps:$4 sm:$0xff]   ;;  %v2627_v11 = vld [vmem:[#allocation7 + $0x328] ss:$16 sps:$4 sm:$0xff]  }
  0xf5   :  { %1819 = vmatpush1.bf16.msra.mxu0 %v2564_v12  ;;  %1905 = vmatpush1.bf16.msra.mxu1 %v2567_v13  ;;  %v2632_v12 = vld [vmem:[#allocation7 + $0x344] ss:$16 sps:$4 sm:$0xff]   ;;  %v2635_v13 = vld [vmem:[#allocation7 + $0x34c] ss:$16 sps:$4 sm:$0xff]  }
  0xf6   :  { %1831 = vmatprep.subr.bf16.mxu0 %v2572_v14  ;;  %1917 = vmatprep.subr.bf16.mxu1 %v2575_v15  ;;  %v2630_v14 = vld [vmem:[#allocation7 + $0x340] ss:$16 sps:$4 sm:$0xff]   ;;  %v2633_v15 = vld [vmem:[#allocation7 + $0x348] ss:$16 sps:$4 sm:$0xff]  }
 0x18b   :  { %v913_v16 = vpop.f32.mrb[0].mxu0  ;;  %v999_v17 = vpop.f32.mrb[0].mxu1 }
 0x18c   :  { %v915_v18 = vpop.f32.mrb[1].mxu0  ;;  %v1001_v19 = vpop.f32.mrb[1].mxu1  ;;  %v1008_v22 = vmax.f32 %v913_v16, 0.0  ;;  %v1010_v23 = vmax.f32 %v999_v17, 0.0  ;;  %v2638_v16 = vld [vmem:[#allocation7 + $0x364] ss:$16 sps:$4 sm:$0xff]  }
 0x18d   :  { %v917_v20 = vpop.f32.mrb[2].mxu0  ;;  %v1003_v21 = vpop.f32.mrb[2].mxu1  ;;  %v1009_v28 = vmax.f32 %v915_v18, 0.0  ;;  %v1011_v29 = vmax.f32 %v1001_v19, 0.0  ;;  %v2641_v17 = vld [vmem:[#allocation7 + $0x36c] ss:$16 sps:$4 sm:$0xff]  }
 0x18e   :  { %v1012_v24 = vmax.f32 %v917_v20, 0.0  ;;  %v1014_v25 = vmax.f32 %v1003_v21, 0.0  ;;  %v919_v26 = vpop.f32.mrb[3].mxu0  ;;  %v1005_v27 = vpop.f32.mrb[3].mxu1  ;;  %v2636_v18 = vld [vmem:[#allocation7 + $0x360] ss:$16 sps:$4 sm:$0xff]  }
 0x18f   :  { %v1013_v30 = vmax.f32 %v919_v26, 0.0  ;;  %v1015_v31 = vmax.f32 %v1005_v27, 0.0  ;;  %v2639_v19 = vld [vmem:[#allocation7 + $0x368] ss:$16 sps:$4 sm:$0xff]   ;;  %v2644_v20 = vld [vmem:[#allocation7 + $0x384] ss:$16 sps:$4 sm:$0xff]  }
 0x190   :  { %v1016_v32 = vpack.c.bf16 %v1012_v24, %v1008_v22  ;;  %v2845_v33 = vpack.c.bf16 %v1014_v25, %v1010_v23  ;;  %v2647_v21 = vld [vmem:[#allocation7 + $0x38c] ss:$16 sps:$4 sm:$0xff]   ;;  %v2642_v22 = vld [vmem:[#allocation7 + $0x380] ss:$16 sps:$4 sm:$0xff]   ;;  %v2645_v23 = vld [vmem:[#allocation7 + $0x388] ss:$16 sps:$4 sm:$0xff]  }
 0x191   :  { %v1017_v34 = vpack.c.bf16 %v1013_v30, %v1009_v28  ;;  %v1019_v35 = vpack.c.bf16 %v1015_v31, %v1011_v29  ;;  %v2650_v24 = vld [vmem:[#allocation7 + $0x3a4] ss:$16 sps:$4 sm:$0xff]   ;;  %v2653_v25 = vld [vmem:[#allocation7 + $0x3ac] ss:$16 sps:$4 sm:$0xff]   ;;  %v2648_v26 = vld [vmem:[#allocation7 + $0x3a0] ss:$16 sps:$4 sm:$0xff]  }
 0x192   :  { %v2651_v27 = vld [vmem:[#allocation7 + $0x3a8] ss:$16 sps:$4 sm:$0xff]   ;;  %v2656_v28 = vld [vmem:[#allocation7 + $0x3c4] ss:$16 sps:$4 sm:$0xff]   ;;  %v2659_v29 = vld [vmem:[#allocation7 + $0x3cc] ss:$16 sps:$4 sm:$0xff]  }
 0x193   :  { %1820 = vmatprep.mubr.bf16.mxu0 %v1017_v34  ;;  %1906 = vmatprep.mubr.bf16.mxu1 %v1017_v34  ;;  %v2654_v30 = vld [vmem:[#allocation7 + $0x3c0] ss:$16 sps:$4 sm:$0xff]   ;;  %v2657_v31 = vld [vmem:[#allocation7 + $0x3c8] ss:$16 sps:$4 sm:$0xff]   ;;  %v2665_v34 = vld [vmem:[#allocation7 + $0x3ec] ss:$16 sps:$4 sm:$0xff]  }
 0x194   :  { %1821 = vmatmul.mubr.bf16.vlgmr.msra.gmra.mrb[4].mxu0 %v1016_v32  ;;  %1907 = vmatmul.mubr.bf16.vlgmr.msra.gmra.mrb[4].mxu1 %v1016_v32  ;;  %v2662_v32 = vld [vmem:[#allocation7 + $0x3e4] ss:$16 sps:$4 sm:$0xff]  }
 0x195   :  { %1832 = vmatpush1.bf16.msra.mxu0 %v2570_v36  ;;  %1918 = vmatpush1.bf16.msra.mxu1 %v2573_v37  ;;  %v2663_v36 = vld [vmem:[#allocation7 + $0x3e8] ss:$16 sps:$4 sm:$0xff]  }
 0x196   :  { %1863 = vmatprep.mubr.bf16.mxu0 %v1019_v35  ;;  %1949 = vmatprep.mubr.bf16.mxu1 %v1019_v35  ;;  %v2660_v35 = vld [vmem:[#allocation7 + $0x3e0] ss:$16 sps:$4 sm:$0xff]  }
 0x197   :  { %1833 = vmatprep.subr.bf16.mxu0 %v2578_v38  ;;  %1919 = vmatprep.subr.bf16.mxu1 %v2581_v39 }
 0x199   :  { %1834 = vmatpush1.bf16.msra.mxu0 %v2576_v40  ;;  %1920 = vmatpush1.bf16.msra.mxu1 %v2579_v41 }
 0x19a   :  { %1835 = vmatprep.subr.bf16.mxu0 %v2584_v42  ;;  %1921 = vmatprep.subr.bf16.mxu1 %v2587_v43 }
 0x19d   :  { %1836 = vmatpush1.bf16.msra.mxu0 %v2582_v44  ;;  %1922 = vmatpush1.bf16.msra.mxu1 %v2585_v45 }
 0x19e   :  { %1837 = vmatprep.subr.bf16.mxu0 %v2590_v46  ;;  %1923 = vmatprep.subr.bf16.mxu1 %v2593_v47  ;;  %v2666_v47 = vld [vmem:[#allocation2] sm:$0xff] }
 0x1a1   :  { %1838 = vmatpush1.bf16.msra.mxu0 %v2588_v48  ;;  %1924 = vmatpush1.bf16.msra.mxu1 %v2591_v49 }
 0x1a2   :  { %1839 = vmatprep.subr.bf16.mxu0 %v2596_v50  ;;  %1925 = vmatprep.subr.bf16.mxu1 %v2599_v51 }
 0x1a5   :  { %1840 = vmatpush1.bf16.msra.mxu0 %v2594_v52  ;;  %1926 = vmatpush1.bf16.msra.mxu1 %v2597_v53 }
 0x1a6   :  { %1841 = vmatprep.subr.bf16.mxu0 %v2602_v54  ;;  %1927 = vmatprep.subr.bf16.mxu1 %v2605_v55  ;;  %v2668_v55 = vld [vmem:[#allocation2 + $0x18] sm:$0xff] }
 0x1a9   :  { %1842 = vmatpush1.bf16.msra.mxu0 %v2600_v56  ;;  %1928 = vmatpush1.bf16.msra.mxu1 %v2603_v57 }
 0x1aa   :  { %1843 = vmatprep.subr.bf16.mxu0 %v2608_v58  ;;  %1929 = vmatprep.subr.bf16.mxu1 %v2611_v59  ;;  %v2669_v59 = vld [vmem:[#allocation2 + $0x20] sm:$0xff] }
 0x1ad   :  { %1844 = vmatpush1.bf16.msra.mxu0 %v2606_v60  ;;  %1930 = vmatpush1.bf16.msra.mxu1 %v2609_v61 }
 0x1ae   :  { %1845 = vmatprep.subr.bf16.mxu0 %v2614_v62  ;;  %1931 = vmatprep.subr.bf16.mxu1 %v2617_v63  ;;  %v2671_v63 = vld [vmem:[#allocation2 + $0x38] sm:$0xff] }
 0x1b1   :  { %1846 = vmatpush1.bf16.msra.mxu0 %v2612_v0  ;;  %1932 = vmatpush1.bf16.msra.mxu1 %v2615_v1 }
 0x1b2   :  { %1847 = vmatprep.subr.bf16.mxu0 %v2620_v2  ;;  %1933 = vmatprep.subr.bf16.mxu1 %v2623_v3 }
 0x1b5   :  { %1848 = vmatpush1.bf16.msra.mxu0 %v2618_v4  ;;  %1934 = vmatpush1.bf16.msra.mxu1 %v2621_v5 }
 0x1b6   :  { %1849 = vmatprep.subr.bf16.mxu0 %v2626_v6  ;;  %1935 = vmatprep.subr.bf16.mxu1 %v2629_v7 }
 0x1b9   :  { %1850 = vmatpush1.bf16.msra.mxu0 %v2624_v8  ;;  %1936 = vmatpush1.bf16.msra.mxu1 %v2627_v11 }
 0x1ba   :  { %1851 = vmatprep.subr.bf16.mxu0 %v2632_v12  ;;  %1937 = vmatprep.subr.bf16.mxu1 %v2635_v13 }
 0x1bd   :  { %1852 = vmatpush1.bf16.msra.mxu0 %v2630_v14  ;;  %1938 = vmatpush1.bf16.msra.mxu1 %v2633_v15 }
 0x1be   :  { %1853 = vmatprep.subr.bf16.mxu0 %v2638_v16  ;;  %1939 = vmatprep.subr.bf16.mxu1 %v2641_v17 }
 0x1c1   :  { %1854 = vmatpush1.bf16.msra.mxu0 %v2636_v18  ;;  %1940 = vmatpush1.bf16.msra.mxu1 %v2639_v19 }
 0x1c2   :  { %1855 = vmatprep.subr.bf16.mxu0 %v2644_v20  ;;  %1941 = vmatprep.subr.bf16.mxu1 %v2647_v21 }
 0x1c5   :  { %1856 = vmatpush1.bf16.msra.mxu0 %v2642_v22  ;;  %1942 = vmatpush1.bf16.msra.mxu1 %v2645_v23 }
 0x1c6   :  { %1857 = vmatprep.subr.bf16.mxu0 %v2650_v24  ;;  %1943 = vmatprep.subr.bf16.mxu1 %v2653_v25 }
 0x1c9   :  { %1858 = vmatpush1.bf16.msra.mxu0 %v2648_v26  ;;  %1944 = vmatpush1.bf16.msra.mxu1 %v2651_v27 }
 0x1ca   :  { %1859 = vmatprep.subr.bf16.mxu0 %v2656_v28  ;;  %1945 = vmatprep.subr.bf16.mxu1 %v2659_v29 }
 0x1cd   :  { %1860 = vmatpush1.bf16.msra.mxu0 %v2654_v30  ;;  %1946 = vmatpush1.bf16.msra.mxu1 %v2657_v31 }
 0x1ce   :  { %1861 = vmatprep.subr.bf16.mxu0 %v2662_v32  ;;  %1947 = vmatprep.subr.bf16.mxu1 %v2665_v34 }
 0x1d1   :  { %1862 = vmatpush1.bf16.msra.mxu0 %v2660_v35  ;;  %1948 = vmatpush1.bf16.msra.mxu1 %v2663_v36 }
 0x1d4   :  { %1864 = vmatmul.mubr.bf16.vlgmr.msra.gmra.mrb[4].mxu0 %v2845_v33  ;;  %1950 = vmatmul.mubr.bf16.vlgmr.msra.gmra.mrb[4].mxu1 %v2845_v33  ;;  %v2667_v33 = vld [vmem:[#allocation2 + $0x8] sm:$0xff] }
 0x2a7   :  { %v1865_v37 = vpop.f32.mrb[4].mxu0  ;;  %v1951_v38 = vpop.f32.mrb[4].mxu1 }
 0x2a8   :  { %v1960_v39 = vmax.f32 %v1865_v37, 0.0  ;;  %v1962_v40 = vmax.f32 %v1951_v38, 0.0  ;;  %v1867_v41 = vpop.f32.mrb[5].mxu0  ;;  %v1953_v42 = vpop.f32.mrb[5].mxu1 }
 0x2a9   :  { %v1961_v43 = vmax.f32 %v1867_v41, 0.0  ;;  %v1963_v44 = vmax.f32 %v1953_v42, 0.0  ;;  %v1869_v45 = vpop.f32.mrb[6].mxu0  ;;  %v1955_v46 = vpop.f32.mrb[6].mxu1 }
 0x2aa   :  { %v1968_v48 = vadd.f32 %v2666_v47, %v1960_v39  ;;  %v1970_v49 = vadd.f32 %v1962_v40, %v2839_v9  ;;  %v1964_v50 = vmax.f32 %v1869_v45, 0.0  ;;  %v1966_v51 = vmax.f32 %v1955_v46, 0.0  ;;  %v1871_v52 = vpop.f32.mrb[7].mxu0  ;;  %v1957_v53 = vpop.f32.mrb[7].mxu1  ;;  %v2670_v9 = vld [vmem:[#allocation2 + $0x28] sm:$0xff] }
 0x2ab   :  { %v1969_v54 = vadd.f32 %v2667_v33, %v1961_v43  ;;  %v1971_v56 = vadd.f32 %v2668_v55, %v1963_v44  ;;  %v1965_v57 = vmax.f32 %v1871_v52, 0.0  ;;  %v1967_v58 = vmax.f32 %v1957_v53, 0.0 }
 0x2ac   :  { %1976 = vst [vmem:[#allocation8] sm:$0xff] %v1968_v48  ;;  %1978 = vst [vmem:[#allocation8 + $0x10] sm:$0xff] %v1970_v49  ;;  %v1972_v60 = vadd.f32 %v2669_v59, %v1964_v50  ;;  %v1974_v61 = vadd.f32 %v1966_v51, %v2841_v10 }
 0x2ad   :  { %1977 = vst [vmem:[#allocation8 + $0x8] sm:$0xff] %v1969_v54  ;;  %1979 = vst [vmem:[#allocation8 + $0x18] sm:$0xff] %v1971_v56  ;;  %v1973_v62 = vadd.f32 %v2670_v9, %v1965_v57  ;;  %v1975_v0 = vadd.f32 %v2671_v63, %v1967_v58 }
 0x2ae   :  { %1980 = vst [vmem:[#allocation8 + $0x20] sm:$0xff] %v1972_v60  ;;  %1982 = vst [vmem:[#allocation8 + $0x30] sm:$0xff] %v1974_v61 }
 0x2af   :  { %1981 = vst [vmem:[#allocation8 + $0x28] sm:$0xff] %v1973_v62  ;;  %1983 = vst [vmem:[#allocation8 + $0x38] sm:$0xff] %v1975_v0 }
 0x2b0   :  { %2749 = shalt.err (!%p2746_p0)
}
 0x2b1   :  { %s2750_s27 = scalar_lea.hbm %s2869_s3, 1024 }
 0x2b2   :  { %p2751_p1 = scmp.ne.s32.totalorder %s2869_s3, %s2750_s27  ;;  %p2754_p2 = scmp.lt.u32.totalorder %s2750_s27, %s2869_s3 }
 0x2b4   :  { %p2756_p3 = pnand %p2754_p2, %p2751_p1 }
 0x2b6   :  { %2759 = shalt.err (!%p2756_p3)
}
 0x2b7   :  { %1995 = dma.vmem_to_hbm [thread:$0]  %s1990_s22, 1024, %s2869_s3, [#allocation4], %s2770_s1, %s2770_s1, %s2771_s9  }
 0x2b8   :  { %2764 = dma.done.wait [#allocation4], 1024  }
 0x2b9   :  { %2765 = vsyncadd [#allocation4], 4294966272 }
 0x2ba   :  { %1999 = vsyncpa [#allocation3], 1 }
 0x2bb   :  { %2000 = vsyncpa [#allocation6], 1 }
 0x2bc   :  { %2001 = vsyncpa [#allocation4], 1 }

</bundles_post_ra>
